<compile_context>
chip_gen: v6e
topology: v6e:2x2x1
jax: 0.10.0
libtpu: 0.0.40
codegen_flags: <defaults>
</compile_context>

<pallas_src>
import jax
import jax.numpy as jnp
from jax.experimental import pallas as pl
from jax.experimental.pallas import tpu as pltpu

# Packed-parameter buffer layout (rows of a (272, 128) f32 array).
_W1_ROWS = (0, 8)      # W1 lives in [:4, :30]   (input features padded 4 -> 8)
_W2_ROWS = (8, 136)    # W2 lives in [:30, :25]  (hidden padded 30 -> 128)
_W3_ROWS = (136, 264)  # W3 lives in [:25, :2]   (hidden 25 -> 128, out 2 -> 128)
_B_ROWS = (264, 272)   # row 0 = b1, row 1 = b2, row 2 = b3 (each lane-padded)
_PACK_ROWS = 272
_LANES = 128
_IN_PAD = 8            # input features padded 4 -> 8
_OUT_PAD = 8           # stored output lanes (2 real logits + 6 zero lanes)


def policy_net_kernel(x_ref, p_ref, o_ref):
    x = x_ref[...]                                   # (TB, 8)   padded obs
    w1 = p_ref[_W1_ROWS[0]:_W1_ROWS[1], :]           # (8, 128)
    w2 = p_ref[_W2_ROWS[0]:_W2_ROWS[1], :]           # (128, 128)
    w3 = p_ref[_W3_ROWS[0]:_W3_ROWS[1], :]           # (128, 128)
    biases = p_ref[_B_ROWS[0]:_B_ROWS[1], :]         # (8, 128) aligned load
    b1 = biases[0:1, :]
    b2 = biases[1:2, :]
    b3 = biases[2:3, :]

    h1 = jnp.maximum(jnp.dot(x, w1, preferred_element_type=jnp.float32) + b1, 0.0)
    h2 = jnp.maximum(jnp.dot(h1, w2, preferred_element_type=jnp.float32) + b2, 0.0)
    o = jnp.dot(h2, w3, preferred_element_type=jnp.float32) + b3      # (TB, 128)
    # Only the first 2 lanes carry real logits (padded lanes are exactly 0);
    # store a narrow 8-lane slab -> 16x less HBM writeback than 128 lanes.
    o_ref[...] = o[:, :_OUT_PAD].astype(o_ref.dtype)


def _round_up(n, m):
    return ((n + m - 1) // m) * m


def pack_params(params):
    """Pack (w1, b1, w2, b2, w3, b3) into one zero-padded (272, 128) f32 buffer."""
    w1, b1, w2, b2, w3, b3 = params
    p = jnp.zeros((_PACK_ROWS, _LANES), jnp.float32)
    p = p.at[_W1_ROWS[0]:_W1_ROWS[0] + 4, 0:30].set(w1)
    p = p.at[_W2_ROWS[0]:_W2_ROWS[0] + 30, 0:25].set(w2)
    p = p.at[_W3_ROWS[0]:_W3_ROWS[0] + 25, 0:2].set(w3)
    p = p.at[_B_ROWS[0] + 0, 0:30].set(b1.reshape(-1))
    p = p.at[_B_ROWS[0] + 1, 0:25].set(b2.reshape(-1))
    p = p.at[_B_ROWS[0] + 2, 0:2].set(b3.reshape(-1))
    return p


def _choose_batch_tile(B, block_b):
    """Pick (tile_rows, padded_rows) for the 1-D batch grid."""
    pb8 = _round_up(B, 8)
    if pb8 <= 256:
        # Tiny batch (single-env / small rollout): one minimal tile, no point
        # padding up to a huge tile just to fill the grid.
        return pb8, pb8
    # Large-tile efficiency plateau (>= 256..1024 rows) while guaranteeing at
    # least 2 grid tiles so both v7x TensorCores get work ("parallel" axis).
    half = (pb8 + 1) // 2
    tb = min(block_b, max(256, _round_up(half, 256)))
    pb = _round_up(pb8, tb)
    return tb, pb


def policy_net_forward(x, packed_params, *, block_b=2048):
    """x: (B, 4) f32 observations -> (B, 2) f32 logits."""
    B = x.shape[0]
    tb, pb = _choose_batch_tile(B, block_b)
    x_pad = jnp.zeros((pb, _IN_PAD), x.dtype).at[:B, : x.shape[1]].set(x)

    out = pl.pallas_call(
        policy_net_kernel,
        out_shape=jax.ShapeDtypeStruct((pb, _OUT_PAD), jnp.float32),
        grid=(pb // tb,),
        in_specs=[
            pl.BlockSpec((tb, _IN_PAD), lambda i: (i, 0)),
            # Constant index_map: params DMA'd once, stay VMEM-resident per tile.
            pl.BlockSpec((_PACK_ROWS, _LANES), lambda i: (0, 0)),
        ],
        out_specs=pl.BlockSpec((tb, _OUT_PAD), lambda i: (i, 0)),
        compiler_params=pltpu.CompilerParams(dimension_semantics=("parallel",)),
    )(x_pad, packed_params)
    return out[:B, :2]


def init_params(key):
    """Deterministic init mimicking nn.Linear default (uniform +/- 1/sqrt(fan_in))."""
    dims = [(4, 30), (30, 25), (25, 2)]
    params = []
    for i, (fan_in, fan_out) in enumerate(dims):
        kw, kb = jax.random.split(jax.random.fold_in(key, i))
        bound = 1.0 / jnp.sqrt(float(fan_in))
        w = jax.random.uniform(kw, (fan_in, fan_out), jnp.float32, -bound, bound)
        b = jax.random.uniform(kb, (1, fan_out), jnp.float32, -bound, bound)
        params.extend([w, b])
    return tuple(params)


def reference_forward(x, params):
    w1, b1, w2, b2, w3, b3 = params
    hp = jax.lax.Precision.HIGHEST
    h1 = jnp.maximum(jnp.dot(x, w1, precision=hp) + b1, 0.0)
    h2 = jnp.maximum(jnp.dot(h1, w2, precision=hp) + b2, 0.0)
    return jnp.dot(h2, w3, precision=hp) + b3


if __name__ == "__main__":
    key = jax.random.PRNGKey(0)
    params = init_params(key)
    packed = pack_params(params)

    # Rollout-style batch: 300 rows -> two 256-row tiles (pads to 512),
    # exercising the >=2-tile parallel grid and the padding path.
    x_big = jax.random.normal(jax.random.fold_in(key, 100), (300, 4), jnp.float32)
    out_big = jax.block_until_ready(policy_net_forward(x_big, packed))
    ref_big = reference_forward(x_big, params)
    assert out_big.shape == (300, 2), out_big.shape
    assert jnp.allclose(out_big, ref_big, atol=1e-5, rtol=1e-5), "batched mismatch"

    # Larger batch: 2500 rows -> two 1280-row tiles, exercising the big-tile path.
    x_huge = jax.random.normal(jax.random.fold_in(key, 300), (2500, 4), jnp.float32)
    out_huge = jax.block_until_ready(policy_net_forward(x_huge, packed))
    ref_huge = reference_forward(x_huge, params)
    assert out_huge.shape == (2500, 2), out_huge.shape
    assert jnp.allclose(out_huge, ref_huge, atol=1e-5, rtol=1e-5), "big-tile mismatch"

    # Small (single-env style) batch: one 8-row tile.
    x_small = jax.random.normal(jax.random.fold_in(key, 200), (8, 4), jnp.float32)
    out_small = jax.block_until_ready(policy_net_forward(x_small, packed))
    ref_small = reference_forward(x_small, params)
    assert out_small.shape == (8, 2), out_small.shape
    assert jnp.allclose(out_small, ref_small, atol=1e-5, rtol=1e-5), "small mismatch"

    print("KERNEL_OK")
</pallas_src>

<mosaic_0001>
module attributes {stable_mosaic.version = 11 : i64} {
  func.func @policy_net_kernel(%arg0: i32, %arg1: memref<256x8xf32, #tpu.memory_space<vmem>>, %arg2: memref<272x128xf32, #tpu.memory_space<vmem>>, %arg3: memref<256x8xf32, #tpu.memory_space<vmem>>) attributes {dimension_semantics = [#tpu.dimension_semantics<parallel>], iteration_bounds = array<i64: 2>, scalar_prefetch = 0 : i64, scratch_operands = 0 : i64, tpu.core_type = #tpu.core_type<tc>, window_params = [{transform_indices = @transform_0, window_bounds = array<i64: 256, 8>}, {pipeline_mode = #tpu.pipeline_mode<synchronous>, transform_indices = @transform_1, window_bounds = array<i64: 272, 128>}, {transform_indices = @transform_2, window_bounds = array<i64: 256, 8>}]} {
    %c0 = arith.constant 0 : index
    %c0_0 = arith.constant 0 : index
    %0 = vector.load %arg1[%c0, %c0_0] : memref<256x8xf32, #tpu.memory_space<vmem>>, vector<256x8xf32>
    %c0_1 = arith.constant 0 : index
    %c0_2 = arith.constant 0 : index
    %1 = vector.load %arg2[%c0_1, %c0_2] : memref<272x128xf32, #tpu.memory_space<vmem>>, vector<8x128xf32>
    %c8 = arith.constant 8 : index
    %c0_3 = arith.constant 0 : index
    %2 = vector.load %arg2[%c8, %c0_3] : memref<272x128xf32, #tpu.memory_space<vmem>>, vector<128x128xf32>
    %c136 = arith.constant 136 : index
    %c0_4 = arith.constant 0 : index
    %3 = vector.load %arg2[%c136, %c0_4] : memref<272x128xf32, #tpu.memory_space<vmem>>, vector<128x128xf32>
    %c264 = arith.constant 264 : index
    %c0_5 = arith.constant 0 : index
    %4 = vector.load %arg2[%c264, %c0_5] : memref<272x128xf32, #tpu.memory_space<vmem>>, vector<8x128xf32>
    %5 = vector.extract_strided_slice %4 {offsets = [0, 0], sizes = [1, 128], strides = [1, 1]} : vector<8x128xf32> to vector<1x128xf32>
    %6 = vector.extract_strided_slice %4 {offsets = [1, 0], sizes = [1, 128], strides = [1, 1]} : vector<8x128xf32> to vector<1x128xf32>
    %7 = vector.extract_strided_slice %4 {offsets = [2, 0], sizes = [1, 128], strides = [1, 1]} : vector<8x128xf32> to vector<1x128xf32>
    %cst = arith.constant dense<0.000000e+00> : vector<256x128xf32>
    %8 = tpu.matmul %0, %1, %cst {dimension_numbers = #tpu.dot_dimension_numbers<[1], [0], [0], [1], [0, 0, 1, 1], [], []>} : vector<256x8xf32>, vector<8x128xf32>, vector<256x128xf32> -> vector<256x128xf32>
    %9 = vector.broadcast %5 : vector<1x128xf32> to vector<256x128xf32>
    %10 = arith.addf %8, %9 : vector<256x128xf32>
    %cst_6 = arith.constant 0.000000e+00 : f32
    %11 = vector.broadcast %cst_6 : f32 to vector<256x128xf32>
    %12 = arith.maximumf %10, %11 : vector<256x128xf32>
    %cst_7 = arith.constant dense<0.000000e+00> : vector<256x128xf32>
    %13 = tpu.matmul %12, %2, %cst_7 {dimension_numbers = #tpu.dot_dimension_numbers<[1], [0], [0], [1], [0, 0, 1, 1], [], []>} : vector<256x128xf32>, vector<128x128xf32>, vector<256x128xf32> -> vector<256x128xf32>
    %14 = vector.broadcast %6 : vector<1x128xf32> to vector<256x128xf32>
    %15 = arith.addf %13, %14 : vector<256x128xf32>
    %cst_8 = arith.constant 0.000000e+00 : f32
    %16 = vector.broadcast %cst_8 : f32 to vector<256x128xf32>
    %17 = arith.maximumf %15, %16 : vector<256x128xf32>
    %cst_9 = arith.constant dense<0.000000e+00> : vector<256x128xf32>
    %18 = tpu.matmul %17, %3, %cst_9 {dimension_numbers = #tpu.dot_dimension_numbers<[1], [0], [0], [1], [0, 0, 1, 1], [], []>} : vector<256x128xf32>, vector<128x128xf32>, vector<256x128xf32> -> vector<256x128xf32>
    %19 = vector.broadcast %7 : vector<1x128xf32> to vector<256x128xf32>
    %20 = arith.addf %18, %19 : vector<256x128xf32>
    %21 = vector.extract_strided_slice %20 {offsets = [0, 0], sizes = [256, 8], strides = [1, 1]} : vector<256x128xf32> to vector<256x8xf32>
    %c0_10 = arith.constant 0 : index
    %c0_11 = arith.constant 0 : index
    %22 = vector.load %arg3[%c0_10, %c0_11] : memref<256x8xf32, #tpu.memory_space<vmem>>, vector<256x8xf32>
    tpu.vector_store %arg3[%c0_10, %c0_11], %21 {strides = array<i32>} : memref<256x8xf32, #tpu.memory_space<vmem>>, vector<256x8xf32>,
    return
  }
  func.func @transform_0(%arg0: i32) -> (i32, i32) {
    %c0_i32 = arith.constant 0 : i32
    %c0_i32_0 = arith.constant 0 : i32
    return %arg0, %c0_i32 : i32, i32
  }
  func.func @transform_1(%arg0: i32) -> (i32, i32) {
    %c0_i32 = arith.constant 0 : i32
    %c0_i32_0 = arith.constant 0 : i32
    %c0_i32_1 = arith.constant 0 : i32
    return %c0_i32, %c0_i32_0 : i32, i32
  }
  func.func @transform_2(%arg0: i32) -> (i32, i32) {
    %c0_i32 = arith.constant 0 : i32
    %c0_i32_0 = arith.constant 0 : i32
    return %arg0, %c0_i32 : i32, i32
  }
}

</mosaic_0001>

<bundles_post_ra>
// kernel: tpu_custom_call.1
= control target key start
LH: loop header
LB: loop body
LE: loop exit
PB: predicated region body
PF: predicated region fallthrough
CT: control target
= control target key end

     0   :  { %s1564_s9 = smov 0   ;;  %s1943_s0 = inlined_call_operand.vmem [shape: f32[512,8], index: 0, kind: input, shape index: {}]   ;;  %s1944_s1 = inlined_call_operand.vmem [shape: f32[272,128], index: 1, kind: input, shape index: {}]   ;;  %s1945_s2 = inlined_call_operand.vmem [shape: f32[512,8], index: 2, kind: output, shape index: {}]  }
   0x1 LB: > { %s1149_s10 = sadd.s32 4294967295, %s1547_s9   ;;  %p1153_p0 = scmp.ge.s32.totalorder %s1547_s9, 1  ;;  %s1547_s9 = sphi %s1564_s9, %s12_s9  }
   0x2   : > { %p113_p1 = scmp.lt.s32.totalorder %s1547_s9, 3 }
   0x4   : > { %p114_p2 = pnand %p1153_p0, %p113_p1 }
   0x5   : > { %s1154_s13 = sshll.u32 (!%p114_p2), %s1149_s10, 5 }
   0x6   : > { %117 = sbr.rel (%p114_p2) target bundleno = 674 (0x2a2), region = 28  ;;  %p136_p3 = scmp.lt.s32.totalorder (!%p114_p2), %s1154_s13, 63 }
   0xb   : > { %v179_v0 = vld [vmem:[%s1944_s1] sm:$0xff]  ;;  %s1947_s13 = smov (!%p136_p3, %s1154_s13), 63  ;;  %vm217_vm0 = vcmask 64512   ;;  %v194_v10 = vld [vmem:[%s1944_s1 + $0x78] sm:$0xff]  ;;  %v193_v15 = vld [vmem:[%s1944_s1 + $0x70] sm:$0xff]  ;;  %v213_v62 = vlaneseq }
   0xc   : > { %v195_v1 = vld [vmem:[%s1944_s1 + $0x80] sm:$0xff]  ;;  %1321 = vmatprep.subr.mxu0 %v179_v0  ;;  %1531 = vmatprep.subr.mxu1 %v179_v0  ;;  %s1155_s16 = sshll.u32 %s1947_s13, 3  ;;  %v192_v17 = vld [vmem:[%s1944_s1 + $0x68] sm:$0xff]  ;;  %v190_v26 = vld [vmem:[%s1944_s1 + $0x58] sm:$0xff] }
   0xd   : > { %1322 = vmatpush3.msra.mxu0 %v179_v0  ;;  %1532 = vmatpush3.msra.mxu1 %v179_v0  ;;  %s1586_s19 = scalar_lea.vmem %s1943_s0, %s1155_s16  ;;  %v191_v21 = vld [vmem:[%s1944_s1 + $0x60] sm:$0xff]  ;;  %v189_v28 = vld [vmem:[%s1944_s1 + $0x50] sm:$0xff]  ;;  %v188_v32 = vld [vmem:[%s1944_s1 + $0x48] sm:$0xff]  ;;  %v1736_v63 = vshrl.u32 %v213_v62, 7  ;;  %s1842_s8 = scalar_lea.vmem %s1945_s2, %s1155_s16 }
   0xe   : > { %1371 = vmatprep.subr.mxu1 %v195_v1  ;;  %v147_v2 = vld [vmem:[%s1586_s19] sm:$0xff]  ;;  %v148_v3 = vld [vmem:[%s1586_s19 + $0x8] sm:$0xff]  ;;  %v149_v4 = vld [vmem:[%s1586_s19 + $0x10] sm:$0xff] }
   0xf   : > { %1323 = vmatprep.mubr.msk.f32.mxu0 %vm217_vm0, %v147_v2  ;;  %v150_v5 = vld [vmem:[%s1586_s19 + $0x18] sm:$0xff]  ;;  %v151_v6 = vld [vmem:[%s1586_s19 + $0x20] sm:$0xff]  ;;  %v164_v8 = vld [vmem:[%s1586_s19 + $0x88] sm:$0xff]  ;;  %v215_v0 = vsub.s32 0, %v1736_v63 }
  0x10   : > { %1324 = vmatmul.mubr.msk.f32.vlgmr.msra.gmra.mxu0 %vm217_vm0, %v148_v3  ;;  %v163_v7 = vld [vmem:[%s1586_s19 + $0x80] sm:$0xff]  ;;  %v165_v9 = vld [vmem:[%s1586_s19 + $0x90] sm:$0xff]  ;;  %v152_v11 = vld [vmem:[%s1586_s19 + $0x28] sm:$0xff] }
  0x11   : > { %1326 = vmatprep.mubr.msk.f32.mxu0 %vm217_vm0, %v149_v4  ;;  %1347 = vmatprep.mubr.msk.f32.mxu1 %vm217_vm0, %v163_v7  ;;  %v153_v12 = vld [vmem:[%s1586_s19 + $0x30] sm:$0xff]  ;;  %v166_v13 = vld [vmem:[%s1586_s19 + $0x98] sm:$0xff]  ;;  %v167_v14 = vld [vmem:[%s1586_s19 + $0xa0] sm:$0xff] }
  0x12   : > { %1348 = vmatmul.mubr.msk.f32.vlgmr.msra.gmra.mxu1 %vm217_vm0, %v164_v8  ;;  %v154_v16 = vld [vmem:[%s1586_s19 + $0x38] sm:$0xff]  ;;  %v155_v18 = vld [vmem:[%s1586_s19 + $0x40] sm:$0xff]  ;;  %v168_v19 = vld [vmem:[%s1586_s19 + $0xa8] sm:$0xff] }
  0x13   : > { %1350 = vmatprep.mubr.msk.f32.mxu1 %vm217_vm0, %v165_v9  ;;  %1372 = vmatpush3.msra.mxu1 %v195_v1  ;;  %v169_v20 = vld [vmem:[%s1586_s19 + $0xb0] sm:$0xff]  ;;  %v156_v22 = vld [vmem:[%s1586_s19 + $0x48] sm:$0xff]  ;;  %v170_v24 = vld [vmem:[%s1586_s19 + $0xb8] sm:$0xff] }
  0x14   : > { %1327 = vmatmul.mubr.msk.f32.gmra.mxu0 %vm217_vm0, %v150_v5  ;;  %1373 = vmatprep.subr.mxu1 %v194_v10  ;;  %v157_v23 = vld [vmem:[%s1586_s19 + $0x50] sm:$0xff]  ;;  %v171_v25 = vld [vmem:[%s1586_s19 + $0xc0] sm:$0xff]  ;;  %v158_v27 = vld [vmem:[%s1586_s19 + $0x58] sm:$0xff] }
  0x15   : > { %1329 = vmatprep.mubr.msk.f32.mxu0 %vm217_vm0, %v151_v6  ;;  %1374 = vmatpush3.msra.mxu1 %v194_v10  ;;  %v159_v29 = vld [vmem:[%s1586_s19 + $0x60] sm:$0xff]  ;;  %v172_v30 = vld [vmem:[%s1586_s19 + $0xc8] sm:$0xff]  ;;  %v173_v31 = vld [vmem:[%s1586_s19 + $0xd0] sm:$0xff] }
  0x16   : > { %1351 = vmatmul.mubr.msk.f32.gmra.mxu1 %vm217_vm0, %v166_v13  ;;  %1375 = vmatprep.subr.mxu1 %v193_v15  ;;  %v160_v33 = vld [vmem:[%s1586_s19 + $0x68] sm:$0xff]  ;;  %v161_v34 = vld [vmem:[%s1586_s19 + $0x70] sm:$0xff]  ;;  %v174_v35 = vld [vmem:[%s1586_s19 + $0xd8] sm:$0xff] }
  0x17   : > { %1353 = vmatprep.mubr.msk.f32.mxu1 %vm217_vm0, %v167_v14  ;;  %1376 = vmatpush3.msra.mxu1 %v193_v15  ;;  %v175_v36 = vld [vmem:[%s1586_s19 + $0xe0] sm:$0xff]  ;;  %v162_v38 = vld [vmem:[%s1586_s19 + $0x78] sm:$0xff]  ;;  %v176_v40 = vld [vmem:[%s1586_s19 + $0xe8] sm:$0xff] }
  0x18   : > { %1330 = vmatmul.mubr.msk.f32.gmra.mxu0 %vm217_vm0, %v152_v11  ;;  %1377 = vmatprep.subr.mxu1 %v192_v17  ;;  %v187_v37 = vld [vmem:[%s1944_s1 + $0x40] sm:$0xff]  ;;  %v186_v39 = vld [vmem:[%s1944_s1 + $0x38] sm:$0xff]  ;;  %v177_v41 = vld [vmem:[%s1586_s19 + $0xf0] sm:$0xff] }
  0x19   : > { %1332 = vmatprep.mubr.msk.f32.mxu0 %vm217_vm0, %v153_v12  ;;  %1378 = vmatpush3.msra.mxu1 %v192_v17  ;;  %v185_v42 = vld [vmem:[%s1944_s1 + $0x30] sm:$0xff]  ;;  %v178_v43 = vld [vmem:[%s1586_s19 + $0xf8] sm:$0xff]  ;;  %v184_v44 = vld [vmem:[%s1944_s1 + $0x28] sm:$0xff] }
  0x1a   : > { %1354 = vmatmul.mubr.msk.f32.gmra.mxu1 %vm217_vm0, %v168_v19  ;;  %1379 = vmatprep.subr.mxu1 %v191_v21  ;;  %v183_v45 = vld [vmem:[%s1944_s1 + $0x20] sm:$0xff]  ;;  %v182_v46 = vld [vmem:[%s1944_s1 + $0x18] sm:$0xff]  ;;  %v181_v47 = vld [vmem:[%s1944_s1 + $0x10] sm:$0xff] }
  0x1b   : > { %1356 = vmatprep.mubr.msk.f32.mxu1 %vm217_vm0, %v169_v20  ;;  %1380 = vmatpush3.msra.mxu1 %v191_v21  ;;  %v180_v48 = vld [vmem:[%s1944_s1 + $0x8] sm:$0xff]  ;;  %v211_v49 = vld [vmem:[%s1944_s1 + $0x100] sm:$0xff]  ;;  %v210_v50 = vld [vmem:[%s1944_s1 + $0xf8] sm:$0xff] }
  0x1c   : > { %1333 = vmatmul.mubr.msk.f32.gmra.mxu0 %vm217_vm0, %v154_v16  ;;  %1381 = vmatprep.subr.mxu1 %v190_v26  ;;  %v209_v51 = vld [vmem:[%s1944_s1 + $0xf0] sm:$0xff]  ;;  %v208_v52 = vld [vmem:[%s1944_s1 + $0xe8] sm:$0xff]  ;;  %v207_v53 = vld [vmem:[%s1944_s1 + $0xe0] sm:$0xff] }
  0x1d   : > { %1335 = vmatprep.mubr.msk.f32.mxu0 %vm217_vm0, %v155_v18  ;;  %1382 = vmatpush3.msra.mxu1 %v190_v26  ;;  %v206_v54 = vld [vmem:[%s1944_s1 + $0xd8] sm:$0xff]  ;;  %v205_v55 = vld [vmem:[%s1944_s1 + $0xd0] sm:$0xff]  ;;  %v204_v56 = vld [vmem:[%s1944_s1 + $0xc8] sm:$0xff] }
  0x1e   : > { %1357 = vmatmul.mubr.msk.f32.gmra.mxu1 %vm217_vm0, %v170_v24  ;;  %1383 = vmatprep.subr.mxu1 %v189_v28  ;;  %v203_v57 = vld [vmem:[%s1944_s1 + $0xc0] sm:$0xff]  ;;  %v202_v58 = vld [vmem:[%s1944_s1 + $0xb8] sm:$0xff]  ;;  %v201_v59 = vld [vmem:[%s1944_s1 + $0xb0] sm:$0xff] }
  0x1f   : > { %1359 = vmatprep.mubr.msk.f32.mxu1 %vm217_vm0, %v171_v25  ;;  %1384 = vmatpush3.msra.mxu1 %v189_v28  ;;  %v200_v60 = vld [vmem:[%s1944_s1 + $0xa8] sm:$0xff]  ;;  %v199_v61 = vld [vmem:[%s1944_s1 + $0xa0] sm:$0xff] }
  0x20   : > { %1336 = vmatmul.mubr.msk.f32.gmra.mxu0 %vm217_vm0, %v156_v22  ;;  %1385 = vmatprep.subr.mxu1 %v188_v32  ;;  %v1742_v1 = vld [vmem:[%s1944_s1 + $0x108] sm:$0xff] }
  0x21   : > { %1338 = vmatprep.mubr.msk.f32.mxu0 %vm217_vm0, %v157_v23  ;;  %1386 = vmatpush3.msra.mxu1 %v188_v32  ;;  %v1745_v2 = vrot.slane %v1742_v1, %v215_v0 }
  0x22   : > { %1360 = vmatmul.mubr.msk.f32.gmra.mxu1 %vm217_vm0, %v172_v30  ;;  %1387 = vmatprep.subr.mxu1 %v187_v37 }
  0x23   : > { %1362 = vmatprep.mubr.msk.f32.mxu1 %vm217_vm0, %v173_v31  ;;  %1388 = vmatpush3.msra.mxu1 %v187_v37 }
  0x24   : > { %1339 = vmatmul.mubr.msk.f32.gmra.mxu0 %vm217_vm0, %v158_v27  ;;  %1389 = vmatprep.subr.mxu1 %v186_v39 }
  0x25   : > { %1341 = vmatprep.mubr.msk.f32.mxu0 %vm217_vm0, %v159_v29  ;;  %1390 = vmatpush3.msra.mxu1 %v186_v39 }
  0x26   : > { %1363 = vmatmul.mubr.msk.f32.gmra.mxu1 %vm217_vm0, %v174_v35  ;;  %1391 = vmatprep.subr.mxu1 %v185_v42 }
  0x27   : > { %1365 = vmatprep.mubr.msk.f32.mxu1 %vm217_vm0, %v175_v36  ;;  %1392 = vmatpush3.msra.mxu1 %v185_v42 }
  0x28   : > { %1342 = vmatmul.mubr.msk.f32.gmra.mxu0 %vm217_vm0, %v160_v33  ;;  %1393 = vmatprep.subr.mxu1 %v184_v44 }
  0x29   : > { %1344 = vmatprep.mubr.msk.f32.mxu0 %vm217_vm0, %v161_v34  ;;  %1394 = vmatpush3.msra.mxu1 %v184_v44 }
  0x2a   : > { %1366 = vmatmul.mubr.msk.f32.gmra.mxu1 %vm217_vm0, %v176_v40  ;;  %1395 = vmatprep.subr.mxu1 %v183_v45 }
  0x2b   : > { %1368 = vmatprep.mubr.msk.f32.mxu1 %vm217_vm0, %v177_v41  ;;  %1396 = vmatpush3.msra.mxu1 %v183_v45 }
  0x2c   : > { %1345 = vmatmul.mubr.msk.f32.gmra.mxu0 %vm217_vm0, %v162_v38  ;;  %1397 = vmatprep.subr.mxu1 %v182_v46 }
  0x2d   : > { %1398 = vmatpush3.msra.mxu1 %v182_v46  ;;  %1451 = vmatprep.subr.mxu0 %v211_v49 }
  0x2e   : > { %1369 = vmatmul.mubr.msk.f32.gmra.mxu1 %vm217_vm0, %v178_v43  ;;  %1399 = vmatprep.subr.mxu1 %v181_v47 }
  0x2f   : > { %1400 = vmatpush3.msra.mxu1 %v181_v47  ;;  %1452 = vmatpush3.msra.mxu0 %v211_v49 }
  0x30   : > { %1401 = vmatprep.subr.mxu1 %v180_v48  ;;  %1453 = vmatprep.subr.mxu0 %v210_v50 }
  0x31   : > { %1402 = vmatpush3.msra.mxu1 %v180_v48  ;;  %1454 = vmatpush3.msra.mxu0 %v210_v50 }
  0x32   : > { %1455 = vmatprep.subr.mxu0 %v209_v51 }
  0x33   : > { %1456 = vmatpush3.msra.mxu0 %v209_v51 }
  0x34   : > { %1457 = vmatprep.subr.mxu0 %v208_v52 }
  0x35   : > { %1458 = vmatpush3.msra.mxu0 %v208_v52 }
  0x36   : > { %1459 = vmatprep.subr.mxu0 %v207_v53 }
  0x37   : > { %1460 = vmatpush3.msra.mxu0 %v207_v53 }
  0x38   : > { %1461 = vmatprep.subr.mxu0 %v206_v54 }
  0x39   : > { %1462 = vmatpush3.msra.mxu0 %v206_v54 }
  0x3a   : > { %1463 = vmatprep.subr.mxu0 %v205_v55 }
  0x3b   : > { %1464 = vmatpush3.msra.mxu0 %v205_v55 }
  0x3c   : > { %1465 = vmatprep.subr.mxu0 %v204_v56 }
  0x3d   : > { %1466 = vmatpush3.msra.mxu0 %v204_v56 }
  0x3e   : > { %1467 = vmatprep.subr.mxu0 %v203_v57 }
  0x3f   : > { %1468 = vmatpush3.msra.mxu0 %v203_v57 }
  0x40   : > { %1469 = vmatprep.subr.mxu0 %v202_v58 }
  0x41   : > { %1470 = vmatpush3.msra.mxu0 %v202_v58 }
  0x42   : > { %1471 = vmatprep.subr.mxu0 %v201_v59 }
  0x43   : > { %1472 = vmatpush3.msra.mxu0 %v201_v59 }
  0x44   : > { %1473 = vmatprep.subr.mxu0 %v200_v60 }
  0x45   : > { %1474 = vmatpush3.msra.mxu0 %v200_v60 }
  0x46   : > { %1475 = vmatprep.subr.mxu0 %v199_v61 }
  0x47   : > { %1476 = vmatpush3.msra.mxu0 %v199_v61 }
  0xd0   : > { %v1325_v3 = vpop.f32.mrf.mxu0 }
  0xd1   : > { %v386_v4 = vadd.f32 %v1325_v3, %v1745_v2 }
  0xd2   : > { %v380_v5 = vpop.f32.mrf.mxu0  ;;  %v1749_v9 = vpop.f32.mrf.mxu1 }
  0xd3   : > { %v381_v6 = vadd.f32 %v380_v5, %v1745_v2  ;;  %v540_v10 = vmax.f32 %v386_v4, 0.0  ;;  %v466_v3 = vadd.f32 %v1749_v9, %v1745_v2 }
  0xd4   : > { %v1328_v7 = vpop.f32.mrf.mxu0  ;;  %v460_v14 = vpop.f32.mrf.mxu1 }
  0xd5   : > { %v539_v8 = vmax.f32 %v381_v6, 0.0  ;;  %v396_v11 = vadd.f32 %v1328_v7, %v1745_v2  ;;  %v461_v54 = vadd.f32 %v460_v14, %v1745_v2  ;;  %v556_v7 = vmax.f32 %v466_v3, 0.0 }
  0xd6   : > { %v390_v12 = vpop.f32.mrf.mxu0  ;;  %v1753_v17 = vpop.f32.mrf.mxu1 }
  0xd7   : > { %v391_v13 = vadd.f32 %v390_v12, %v1745_v2  ;;  %1403 = vmatprep.mubr.f32.mxu1 %v539_v8  ;;  %v542_v18 = vmax.f32 %v396_v11, 0.0  ;;  %v555_v61 = vmax.f32 %v461_v54, 0.0  ;;  %v476_v8 = vadd.f32 %v1753_v17, %v1745_v2 }
  0xd8   : > { %v1331_v15 = vpop.f32.mrf.mxu0  ;;  %1404 = vmatmul.mubr.f32.vlgmr.msra.gmra.mxu1 %v540_v10  ;;  %v470_v22 = vpop.f32.mrf.mxu1 }
  0xd9   : > { %v541_v16 = vmax.f32 %v391_v13, 0.0  ;;  %v406_v19 = vadd.f32 %v1331_v15, %v1745_v2  ;;  %v471_v62 = vadd.f32 %v470_v22, %v1745_v2  ;;  %v558_v13 = vmax.f32 %v476_v8, 0.0 }
  0xda   : > { %v400_v20 = vpop.f32.mrf.mxu0  ;;  %v1757_v25 = vpop.f32.mrf.mxu1 }
  0xdb   : > { %v401_v21 = vadd.f32 %v400_v20, %v1745_v2  ;;  %1406 = vmatprep.mubr.f32.mxu1 %v541_v16  ;;  %v544_v26 = vmax.f32 %v406_v19, 0.0  ;;  %v557_v5 = vmax.f32 %v471_v62, 0.0  ;;  %v486_v9 = vadd.f32 %v1757_v25, %v1745_v2 }
  0xdc   : > { %v1334_v23 = vpop.f32.mrf.mxu0  ;;  %1407 = vmatmul.mubr.f32.gmra.mxu1 %v542_v18  ;;  %v480_v30 = vpop.f32.mrf.mxu1 }
  0xdd   : > { %v543_v24 = vmax.f32 %v401_v21, 0.0  ;;  %v416_v27 = vadd.f32 %v1334_v23, %v1745_v2  ;;  %v481_v6 = vadd.f32 %v480_v30, %v1745_v2  ;;  %v560_v18 = vmax.f32 %v486_v9, 0.0 }
  0xde   : > { %v410_v28 = vpop.f32.mrf.mxu0  ;;  %v1358_v36 = vpop.f32.mrf.mxu1 }
  0xdf   : > { %v411_v29 = vadd.f32 %v410_v28, %v1745_v2  ;;  %1409 = vmatprep.mubr.f32.mxu1 %v543_v24  ;;  %v546_v33 = vmax.f32 %v416_v27, 0.0  ;;  %v559_v11 = vmax.f32 %v481_v6, 0.0  ;;  %v496_v19 = vadd.f32 %v1358_v36, %v1745_v2 }
  0xe0   : > { %v1337_v31 = vpop.f32.mrf.mxu0  ;;  %1410 = vmatmul.mubr.f32.gmra.mxu1 %v544_v26  ;;  %v490_v43 = vpop.f32.mrf.mxu1 }
  0xe1   : > { %v545_v32 = vmax.f32 %v411_v29, 0.0  ;;  %v426_v34 = vadd.f32 %v1337_v31, %v1745_v2  ;;  %v491_v12 = vadd.f32 %v490_v43, %v1745_v2  ;;  %v562_v22 = vmax.f32 %v496_v19, 0.0 }
  0xe2   : > { %v420_v35 = vpop.f32.mrf.mxu0  ;;  %v1361_v50 = vpop.f32.mrf.mxu1 }
  0xe3   : > { %v421_v37 = vadd.f32 %v420_v35, %v1745_v2  ;;  %1412 = vmatprep.mubr.f32.mxu1 %v545_v32  ;;  %v548_v40 = vmax.f32 %v426_v34, 0.0  ;;  %v561_v15 = vmax.f32 %v491_v12, 0.0  ;;  %v506_v23 = vadd.f32 %v1361_v50, %v1745_v2 }
  0xe4   : > { %v1340_v38 = vpop.f32.mrf.mxu0  ;;  %1413 = vmatmul.mubr.f32.gmra.mxu1 %v546_v33  ;;  %v500_v58 = vpop.f32.mrf.mxu1 }
  0xe5   : > { %v547_v39 = vmax.f32 %v421_v37, 0.0  ;;  %v436_v41 = vadd.f32 %v1340_v38, %v1745_v2  ;;  %v501_v16 = vadd.f32 %v500_v58, %v1745_v2  ;;  %v564_v27 = vmax.f32 %v506_v23, 0.0  ;;  %v198_v38 = vld [vmem:[%s1944_s1 + $0x98] sm:$0xff] }
  0xe6   : > { %v430_v42 = vpop.f32.mrf.mxu0  ;;  %v1364_v4 = vpop.f32.mrf.mxu1  ;;  %1477 = vmatprep.subr.mxu0 %v198_v38 }
  0xe7   : > { %v431_v44 = vadd.f32 %v430_v42, %v1745_v2  ;;  %1415 = vmatprep.mubr.f32.mxu1 %v547_v39  ;;  %v550_v47 = vmax.f32 %v436_v41, 0.0  ;;  %v563_v20 = vmax.f32 %v501_v16, 0.0  ;;  %v516_v28 = vadd.f32 %v1364_v4, %v1745_v2  ;;  %1478 = vmatpush3.msra.mxu0 %v198_v38  ;;  %v197_v39 = vld [vmem:[%s1944_s1 + $0x90] sm:$0xff] }
  0xe8   : > { %v1343_v45 = vpop.f32.mrf.mxu0  ;;  %1416 = vmatmul.mubr.f32.gmra.mxu1 %v548_v40  ;;  %v510_v10 = vpop.f32.mrf.mxu1  ;;  %1479 = vmatprep.subr.mxu0 %v197_v39  ;;  %v573_v40 = vsub.s32 1, %v1736_v63 }
  0xe9   : > { %v549_v46 = vmax.f32 %v431_v44, 0.0  ;;  %v446_v48 = vadd.f32 %v1343_v45, %v1745_v2  ;;  %v511_v21 = vadd.f32 %v510_v10, %v1745_v2  ;;  %v566_v32 = vmax.f32 %v516_v28, 0.0  ;;  %1480 = vmatpush3.msra.mxu0 %v197_v39 }
  0xea   : > { %v440_v49 = vpop.f32.mrf.mxu0  ;;  %v1367_v14 = vpop.f32.mrf.mxu1  ;;  %v1799_v41 = vrot.slane %v1742_v1, %v573_v40 }
  0xeb   : > { %v441_v51 = vadd.f32 %v440_v49, %v1745_v2  ;;  %1418 = vmatprep.mubr.f32.mxu1 %v549_v46  ;;  %v552_v55 = vmax.f32 %v446_v48, 0.0  ;;  %v565_v25 = vmax.f32 %v511_v21, 0.0  ;;  %v526_v33 = vadd.f32 %v1367_v14, %v1745_v2 }
  0xec   : > { %v1346_v52 = vpop.f32.mrf.mxu0  ;;  %1419 = vmatmul.mubr.f32.gmra.mxu1 %v550_v47  ;;  %v520_v17 = vpop.f32.mrf.mxu1 }
  0xed   : > { %v551_v53 = vmax.f32 %v441_v51, 0.0  ;;  %v456_v56 = vadd.f32 %v1346_v52, %v1745_v2  ;;  %v521_v26 = vadd.f32 %v520_v17, %v1745_v2  ;;  %v568_v35 = vmax.f32 %v526_v33, 0.0 }
  0xee   : > { %v450_v57 = vpop.f32.mrf.mxu0  ;;  %v1370_v24 = vpop.f32.mrf.mxu1 }
  0xef   : > { %v451_v59 = vadd.f32 %v450_v57, %v1745_v2  ;;  %1421 = vmatprep.mubr.f32.mxu1 %v551_v53  ;;  %v554_v0 = vmax.f32 %v456_v56, 0.0  ;;  %v567_v30 = vmax.f32 %v521_v26, 0.0  ;;  %v536_v36 = vadd.f32 %v1370_v24, %v1745_v2 }
  0xf0   : > { %1422 = vmatmul.mubr.f32.gmra.mxu1 %v552_v55  ;;  %v530_v29 = vpop.f32.mrf.mxu1 }
  0xf1   : > { %v553_v60 = vmax.f32 %v451_v59, 0.0  ;;  %v531_v31 = vadd.f32 %v530_v29, %v1745_v2  ;;  %v570_v37 = vmax.f32 %v536_v36, 0.0  ;;  %v196_v2 = vld [vmem:[%s1944_s1 + $0x88] sm:$0xff] }
  0xf2   : > { %1481 = vmatprep.subr.mxu0 %v196_v2 }
  0xf3   : > { %1424 = vmatprep.mubr.f32.mxu1 %v553_v60  ;;  %v569_v34 = vmax.f32 %v531_v31, 0.0  ;;  %1482 = vmatpush3.msra.mxu0 %v196_v2 }
  0xf4   : > { %1425 = vmatmul.mubr.f32.gmra.mxu1 %v554_v0 }
  0xf5   : > { %1427 = vmatprep.mubr.f32.mxu1 %v555_v61 }
  0xf8   : > { %1428 = vmatmul.mubr.f32.gmra.mxu1 %v556_v7 }
  0xf9   : > { %1430 = vmatprep.mubr.f32.mxu1 %v557_v5 }
  0xfc   : > { %1431 = vmatmul.mubr.f32.gmra.mxu1 %v558_v13 }
  0xfd   : > { %1433 = vmatprep.mubr.f32.mxu1 %v559_v11 }
 0x100   : > { %1434 = vmatmul.mubr.f32.gmra.mxu1 %v560_v18 }
 0x101   : > { %1436 = vmatprep.mubr.f32.mxu1 %v561_v15 }
 0x104   : > { %1437 = vmatmul.mubr.f32.gmra.mxu1 %v562_v22 }
 0x105   : > { %1439 = vmatprep.mubr.f32.mxu1 %v563_v20 }
 0x108   : > { %1440 = vmatmul.mubr.f32.gmra.mxu1 %v564_v27 }
 0x109   : > { %1442 = vmatprep.mubr.f32.mxu1 %v565_v25 }
 0x10c   : > { %1443 = vmatmul.mubr.f32.gmra.mxu1 %v566_v32 }
 0x10d   : > { %1445 = vmatprep.mubr.f32.mxu1 %v567_v30 }
 0x110   : > { %1446 = vmatmul.mubr.f32.gmra.mxu1 %v568_v35 }
 0x111   : > { %1448 = vmatprep.mubr.f32.mxu1 %v569_v34 }
 0x114   : > { %1449 = vmatmul.mubr.f32.gmra.mxu1 %v570_v37 }
 0x198   : > { %v1405_v42 = vpop.f32.mrf.mxu1 }
 0x199   : > { %v647_v43 = vadd.f32 %v1405_v42, %v1799_v41 }
 0x19a   : > { %v641_v44 = vpop.f32.mrf.mxu1 }
 0x19b   : > { %v642_v45 = vadd.f32 %v641_v44, %v1799_v41  ;;  %v801_v48 = vmax.f32 %v647_v43, 0.0 }
 0x19c   : > { %v1408_v46 = vpop.f32.mrf.mxu1 }
 0x19d   : > { %v800_v47 = vmax.f32 %v642_v45, 0.0  ;;  %v657_v49 = vadd.f32 %v1408_v46, %v1799_v41 }
 0x19e   : > { %v651_v50 = vpop.f32.mrf.mxu1 }
 0x19f   : > { %v652_v51 = vadd.f32 %v651_v50, %v1799_v41  ;;  %1483 = vmatprep.mubr.f32.mxu0 %v800_v47  ;;  %v803_v54 = vmax.f32 %v657_v49, 0.0 }
 0x1a0   : > { %v1411_v52 = vpop.f32.mrf.mxu1  ;;  %1484 = vmatmul.mubr.f32.vlgmr.msra.gmra.mxu0 %v801_v48 }
 0x1a1   : > { %v802_v53 = vmax.f32 %v652_v51, 0.0  ;;  %v667_v55 = vadd.f32 %v1411_v52, %v1799_v41 }
 0x1a2   : > { %v661_v56 = vpop.f32.mrf.mxu1 }
 0x1a3   : > { %v662_v57 = vadd.f32 %v661_v56, %v1799_v41  ;;  %1486 = vmatprep.mubr.f32.mxu0 %v802_v53  ;;  %v805_v60 = vmax.f32 %v667_v55, 0.0 }
 0x1a4   : > { %v1414_v58 = vpop.f32.mrf.mxu1  ;;  %1487 = vmatmul.mubr.f32.gmra.mxu0 %v803_v54 }
 0x1a5   : > { %v804_v59 = vmax.f32 %v662_v57, 0.0  ;;  %v677_v61 = vadd.f32 %v1414_v58, %v1799_v41 }
 0x1a6   : > { %v671_v62 = vpop.f32.mrf.mxu1 }
 0x1a7   : > { %v672_v0 = vadd.f32 %v671_v62, %v1799_v41  ;;  %1489 = vmatprep.mubr.f32.mxu0 %v804_v59  ;;  %v807_v5 = vmax.f32 %v677_v61, 0.0 }
 0x1a8   : > { %v1417_v3 = vpop.f32.mrf.mxu1  ;;  %1490 = vmatmul.mubr.f32.gmra.mxu0 %v805_v60 }
 0x1a9   : > { %v806_v4 = vmax.f32 %v672_v0, 0.0  ;;  %v687_v6 = vadd.f32 %v1417_v3, %v1799_v41 }
 0x1aa   : > { %v681_v7 = vpop.f32.mrf.mxu1 }
 0x1ab   : > { %v682_v8 = vadd.f32 %v681_v7, %v1799_v41  ;;  %1492 = vmatprep.mubr.f32.mxu0 %v806_v4  ;;  %v809_v12 = vmax.f32 %v687_v6, 0.0 }
 0x1ac   : > { %v1420_v10 = vpop.f32.mrf.mxu1  ;;  %1493 = vmatmul.mubr.f32.gmra.mxu0 %v807_v5 }
 0x1ad   : > { %v808_v11 = vmax.f32 %v682_v8, 0.0  ;;  %v697_v13 = vadd.f32 %v1420_v10, %v1799_v41 }
 0x1ae   : > { %v691_v9 = vpop.f32.mrf.mxu1 }
 0x1af   : > { %v692_v14 = vadd.f32 %v691_v9, %v1799_v41  ;;  %1495 = vmatprep.mubr.f32.mxu0 %v808_v11  ;;  %v811_v18 = vmax.f32 %v697_v13, 0.0 }
 0x1b0   : > { %v1423_v15 = vpop.f32.mrf.mxu1  ;;  %1496 = vmatmul.mubr.f32.gmra.mxu0 %v809_v12 }
 0x1b1   : > { %v810_v16 = vmax.f32 %v692_v14, 0.0  ;;  %v707_v19 = vadd.f32 %v1423_v15, %v1799_v41 }
 0x1b2   : > { %v701_v17 = vpop.f32.mrf.mxu1 }
 0x1b3   : > { %v702_v20 = vadd.f32 %v701_v17, %v1799_v41  ;;  %1498 = vmatprep.mubr.f32.mxu0 %v810_v16  ;;  %v813_v23 = vmax.f32 %v707_v19, 0.0  ;;  %v834_v16 = vsub.s32 2, %v1736_v63 }
 0x1b4   : > { %v1426_v21 = vpop.f32.mrf.mxu1  ;;  %1499 = vmatmul.mubr.f32.gmra.mxu0 %v811_v18 }
 0x1b5   : > { %v812_v22 = vmax.f32 %v702_v20, 0.0  ;;  %v717_v24 = vadd.f32 %v1426_v21, %v1799_v41  ;;  %v1835_v18 = vrot.slane %v1742_v1, %v834_v16 }
 0x1b6   : > { %v711_v25 = vpop.f32.mrf.mxu1 }
 0x1b7   : > { %v712_v26 = vadd.f32 %v711_v25, %v1799_v41  ;;  %1501 = vmatprep.mubr.f32.mxu0 %v812_v22  ;;  %v815_v29 = vmax.f32 %v717_v24, 0.0 }
 0x1b8   : > { %v1429_v27 = vpop.f32.mrf.mxu1  ;;  %1502 = vmatmul.mubr.f32.gmra.mxu0 %v813_v23 }
 0x1b9   : > { %v814_v28 = vmax.f32 %v712_v26, 0.0  ;;  %v727_v30 = vadd.f32 %v1429_v27, %v1799_v41 }
 0x1ba   : > { %v721_v31 = vpop.f32.mrf.mxu1 }
 0x1bb   : > { %v722_v32 = vadd.f32 %v721_v31, %v1799_v41  ;;  %1504 = vmatprep.mubr.f32.mxu0 %v814_v28  ;;  %v817_v35 = vmax.f32 %v727_v30, 0.0 }
 0x1bc   : > { %v1432_v33 = vpop.f32.mrf.mxu1  ;;  %1505 = vmatmul.mubr.f32.gmra.mxu0 %v815_v29 }
 0x1bd   : > { %v816_v34 = vmax.f32 %v722_v32, 0.0  ;;  %v737_v36 = vadd.f32 %v1432_v33, %v1799_v41 }
 0x1be   : > { %v731_v37 = vpop.f32.mrf.mxu1 }
 0x1bf   : > { %v732_v38 = vadd.f32 %v731_v37, %v1799_v41  ;;  %1507 = vmatprep.mubr.f32.mxu0 %v816_v34  ;;  %v819_v40 = vmax.f32 %v737_v36, 0.0 }
 0x1c0   : > { %v1435_v39 = vpop.f32.mrf.mxu1  ;;  %1508 = vmatmul.mubr.f32.gmra.mxu0 %v817_v35 }
 0x1c1   : > { %v818_v2 = vmax.f32 %v732_v38, 0.0  ;;  %v747_v42 = vadd.f32 %v1435_v39, %v1799_v41 }
 0x1c2   : > { %v741_v43 = vpop.f32.mrf.mxu1 }
 0x1c3   : > { %v742_v44 = vadd.f32 %v741_v43, %v1799_v41  ;;  %1510 = vmatprep.mubr.f32.mxu0 %v818_v2  ;;  %v821_v47 = vmax.f32 %v747_v42, 0.0 }
 0x1c4   : > { %v1438_v45 = vpop.f32.mrf.mxu1  ;;  %1511 = vmatmul.mubr.f32.gmra.mxu0 %v819_v40 }
 0x1c5   : > { %v820_v46 = vmax.f32 %v742_v44, 0.0  ;;  %v757_v48 = vadd.f32 %v1438_v45, %v1799_v41 }
 0x1c6   : > { %v751_v49 = vpop.f32.mrf.mxu1 }
 0x1c7   : > { %v752_v50 = vadd.f32 %v751_v49, %v1799_v41  ;;  %1513 = vmatprep.mubr.f32.mxu0 %v820_v46  ;;  %v823_v53 = vmax.f32 %v757_v48, 0.0 }
 0x1c8   : > { %v1441_v51 = vpop.f32.mrf.mxu1  ;;  %1514 = vmatmul.mubr.f32.gmra.mxu0 %v821_v47 }
 0x1c9   : > { %v822_v52 = vmax.f32 %v752_v50, 0.0  ;;  %v767_v54 = vadd.f32 %v1441_v51, %v1799_v41 }
 0x1ca   : > { %v761_v55 = vpop.f32.mrf.mxu1 }
 0x1cb   : > { %v762_v56 = vadd.f32 %v761_v55, %v1799_v41  ;;  %1516 = vmatprep.mubr.f32.mxu0 %v822_v52  ;;  %v825_v59 = vmax.f32 %v767_v54, 0.0 }
 0x1cc   : > { %v1444_v57 = vpop.f32.mrf.mxu1  ;;  %1517 = vmatmul.mubr.f32.gmra.mxu0 %v823_v53 }
 0x1cd   : > { %v824_v58 = vmax.f32 %v762_v56, 0.0  ;;  %v777_v60 = vadd.f32 %v1444_v57, %v1799_v41 }
 0x1ce   : > { %v771_v61 = vpop.f32.mrf.mxu1 }
 0x1cf   : > { %v772_v62 = vadd.f32 %v771_v61, %v1799_v41  ;;  %1519 = vmatprep.mubr.f32.mxu0 %v824_v58  ;;  %v827_v4 = vmax.f32 %v777_v60, 0.0 }
 0x1d0   : > { %v1447_v0 = vpop.f32.mrf.mxu1  ;;  %1520 = vmatmul.mubr.f32.gmra.mxu0 %v825_v59 }
 0x1d1   : > { %v826_v3 = vmax.f32 %v772_v62, 0.0  ;;  %v787_v5 = vadd.f32 %v1447_v0, %v1799_v41 }
 0x1d2   : > { %v781_v6 = vpop.f32.mrf.mxu1 }
 0x1d3   : > { %v782_v7 = vadd.f32 %v781_v6, %v1799_v41  ;;  %1522 = vmatprep.mubr.f32.mxu0 %v826_v3  ;;  %v829_v11 = vmax.f32 %v787_v5, 0.0 }
 0x1d4   : > { %v1450_v8 = vpop.f32.mrf.mxu1  ;;  %1523 = vmatmul.mubr.f32.gmra.mxu0 %v827_v4 }
 0x1d5   : > { %v828_v10 = vmax.f32 %v782_v7, 0.0  ;;  %v797_v12 = vadd.f32 %v1450_v8, %v1799_v41 }
 0x1d6   : > { %v791_v13 = vpop.f32.mrf.mxu1 }
 0x1d7   : > { %v792_v9 = vadd.f32 %v791_v13, %v1799_v41  ;;  %1525 = vmatprep.mubr.f32.mxu0 %v828_v10  ;;  %v831_v15 = vmax.f32 %v797_v12, 0.0 }
 0x1d8   : > { %1526 = vmatmul.mubr.f32.gmra.mxu0 %v829_v11 }
 0x1d9   : > { %v830_v14 = vmax.f32 %v792_v9, 0.0 }
 0x1db   : > { %1528 = vmatprep.mubr.f32.mxu0 %v830_v14 }
 0x1dc   : > { %1529 = vmatmul.mubr.f32.gmra.mxu0 %v831_v15 }
 0x260   : > { %v1485_v41 = vpop.f32.mrf.mxu0 }
 0x261   : > { %v908_v19 = vadd.f32 %v1485_v41, %v1835_v18 }
 0x262   : > { %v902_v17 = vpop.f32.mrf.mxu0 }
 0x263   : > { %1062 = vst.msk [vmem:[%s1842_s8 + $0x8] sm:$0xff] %vm217_vm0, %v908_v19  ;;  %v903_v63 = vadd.f32 %v902_v17, %v1835_v18 }
 0x264   : > { %v1488_v1 = vpop.f32.mrf.mxu0 }
 0x265   : > { %1061 = vst.msk [vmem:[%s1842_s8] sm:$0xff] %vm217_vm0, %v903_v63  ;;  %v918_v20 = vadd.f32 %v1488_v1, %v1835_v18 }
 0x266   : > { %v912_v21 = vpop.f32.mrf.mxu0 }
 0x267   : > { %1064 = vst.msk [vmem:[%s1842_s8 + $0x18] sm:$0xff] %vm217_vm0, %v918_v20  ;;  %v913_v22 = vadd.f32 %v912_v21, %v1835_v18 }
 0x268   : > { %v1491_v23 = vpop.f32.mrf.mxu0 }
 0x269   : > { %1063 = vst.msk [vmem:[%s1842_s8 + $0x10] sm:$0xff] %vm217_vm0, %v913_v22  ;;  %v928_v24 = vadd.f32 %v1491_v23, %v1835_v18 }
 0x26a   : > { %v922_v25 = vpop.f32.mrf.mxu0 }
 0x26b   : > { %1066 = vst.msk [vmem:[%s1842_s8 + $0x28] sm:$0xff] %vm217_vm0, %v928_v24  ;;  %v923_v26 = vadd.f32 %v922_v25, %v1835_v18 }
 0x26c   : > { %v1494_v27 = vpop.f32.mrf.mxu0 }
 0x26d   : > { %1065 = vst.msk [vmem:[%s1842_s8 + $0x20] sm:$0xff] %vm217_vm0, %v923_v26  ;;  %v938_v28 = vadd.f32 %v1494_v27, %v1835_v18 }
 0x26e   : > { %v932_v29 = vpop.f32.mrf.mxu0 }
 0x26f   : > { %1068 = vst.msk [vmem:[%s1842_s8 + $0x38] sm:$0xff] %vm217_vm0, %v938_v28  ;;  %v933_v30 = vadd.f32 %v932_v29, %v1835_v18 }
 0x270   : > { %v1497_v31 = vpop.f32.mrf.mxu0 }
 0x271   : > { %1067 = vst.msk [vmem:[%s1842_s8 + $0x30] sm:$0xff] %vm217_vm0, %v933_v30  ;;  %v948_v32 = vadd.f32 %v1497_v31, %v1835_v18 }
 0x272   : > { %v942_v33 = vpop.f32.mrf.mxu0 }
 0x273   : > { %1070 = vst.msk [vmem:[%s1842_s8 + $0x48] sm:$0xff] %vm217_vm0, %v948_v32  ;;  %v943_v34 = vadd.f32 %v942_v33, %v1835_v18 }
 0x274   : > { %v1500_v35 = vpop.f32.mrf.mxu0 }
 0x275   : > { %1069 = vst.msk [vmem:[%s1842_s8 + $0x40] sm:$0xff] %vm217_vm0, %v943_v34  ;;  %v958_v36 = vadd.f32 %v1500_v35, %v1835_v18 }
 0x276   : > { %v952_v37 = vpop.f32.mrf.mxu0 }
 0x277   : > { %1072 = vst.msk [vmem:[%s1842_s8 + $0x58] sm:$0xff] %vm217_vm0, %v958_v36  ;;  %v953_v38 = vadd.f32 %v952_v37, %v1835_v18 }
 0x278   : > { %v1503_v39 = vpop.f32.mrf.mxu0 }
 0x279   : > { %1071 = vst.msk [vmem:[%s1842_s8 + $0x50] sm:$0xff] %vm217_vm0, %v953_v38  ;;  %v968_v2 = vadd.f32 %v1503_v39, %v1835_v18 }
 0x27a   : > { %v962_v40 = vpop.f32.mrf.mxu0 }
 0x27b   : > { %1074 = vst.msk [vmem:[%s1842_s8 + $0x68] sm:$0xff] %vm217_vm0, %v968_v2  ;;  %v963_v42 = vadd.f32 %v962_v40, %v1835_v18 }
 0x27c   : > { %v1506_v43 = vpop.f32.mrf.mxu0 }
 0x27d   : > { %1073 = vst.msk [vmem:[%s1842_s8 + $0x60] sm:$0xff] %vm217_vm0, %v963_v42  ;;  %v978_v44 = vadd.f32 %v1506_v43, %v1835_v18 }
 0x27e   : > { %v972_v45 = vpop.f32.mrf.mxu0 }
 0x27f   : > { %1076 = vst.msk [vmem:[%s1842_s8 + $0x78] sm:$0xff] %vm217_vm0, %v978_v44  ;;  %v973_v46 = vadd.f32 %v972_v45, %v1835_v18 }
 0x280   : > { %v1509_v47 = vpop.f32.mrf.mxu0 }
 0x281   : > { %1075 = vst.msk [vmem:[%s1842_s8 + $0x70] sm:$0xff] %vm217_vm0, %v973_v46  ;;  %v988_v48 = vadd.f32 %v1509_v47, %v1835_v18 }
 0x282   : > { %v982_v49 = vpop.f32.mrf.mxu0 }
 0x283   : > { %1078 = vst.msk [vmem:[%s1842_s8 + $0x88] sm:$0xff] %vm217_vm0, %v988_v48  ;;  %v983_v50 = vadd.f32 %v982_v49, %v1835_v18 }
 0x284   : > { %v1512_v51 = vpop.f32.mrf.mxu0 }
 0x285   : > { %1077 = vst.msk [vmem:[%s1842_s8 + $0x80] sm:$0xff] %vm217_vm0, %v983_v50  ;;  %v998_v52 = vadd.f32 %v1512_v51, %v1835_v18 }
 0x286   : > { %v992_v53 = vpop.f32.mrf.mxu0 }
 0x287   : > { %1080 = vst.msk [vmem:[%s1842_s8 + $0x98] sm:$0xff] %vm217_vm0, %v998_v52  ;;  %v993_v54 = vadd.f32 %v992_v53, %v1835_v18 }
 0x288   : > { %v1515_v55 = vpop.f32.mrf.mxu0 }
 0x289   : > { %1079 = vst.msk [vmem:[%s1842_s8 + $0x90] sm:$0xff] %vm217_vm0, %v993_v54  ;;  %v1008_v56 = vadd.f32 %v1515_v55, %v1835_v18 }
 0x28a   : > { %v1002_v57 = vpop.f32.mrf.mxu0 }
 0x28b   : > { %1082 = vst.msk [vmem:[%s1842_s8 + $0xa8] sm:$0xff] %vm217_vm0, %v1008_v56  ;;  %v1003_v58 = vadd.f32 %v1002_v57, %v1835_v18 }
 0x28c   : > { %v1518_v59 = vpop.f32.mrf.mxu0 }
 0x28d   : > { %1081 = vst.msk [vmem:[%s1842_s8 + $0xa0] sm:$0xff] %vm217_vm0, %v1003_v58  ;;  %v1018_v60 = vadd.f32 %v1518_v59, %v1835_v18 }
 0x28e   : > { %v1012_v61 = vpop.f32.mrf.mxu0 }
 0x28f   : > { %1084 = vst.msk [vmem:[%s1842_s8 + $0xb8] sm:$0xff] %vm217_vm0, %v1018_v60  ;;  %v1013_v62 = vadd.f32 %v1012_v61, %v1835_v18 }
 0x290   : > { %v1521_v0 = vpop.f32.mrf.mxu0 }
 0x291   : > { %1083 = vst.msk [vmem:[%s1842_s8 + $0xb0] sm:$0xff] %vm217_vm0, %v1013_v62  ;;  %v1028_v3 = vadd.f32 %v1521_v0, %v1835_v18 }
 0x292   : > { %v1022_v4 = vpop.f32.mrf.mxu0 }
 0x293   : > { %1086 = vst.msk [vmem:[%s1842_s8 + $0xc8] sm:$0xff] %vm217_vm0, %v1028_v3  ;;  %v1023_v5 = vadd.f32 %v1022_v4, %v1835_v18 }
 0x294   : > { %v1524_v6 = vpop.f32.mrf.mxu0 }
 0x295   : > { %1085 = vst.msk [vmem:[%s1842_s8 + $0xc0] sm:$0xff] %vm217_vm0, %v1023_v5  ;;  %v1038_v7 = vadd.f32 %v1524_v6, %v1835_v18 }
 0x296   : > { %v1032_v8 = vpop.f32.mrf.mxu0 }
 0x297   : > { %1088 = vst.msk [vmem:[%s1842_s8 + $0xd8] sm:$0xff] %vm217_vm0, %v1038_v7  ;;  %v1033_v10 = vadd.f32 %v1032_v8, %v1835_v18 }
 0x298   : > { %v1527_v11 = vpop.f32.mrf.mxu0 }
 0x299   : > { %1087 = vst.msk [vmem:[%s1842_s8 + $0xd0] sm:$0xff] %vm217_vm0, %v1033_v10  ;;  %v1048_v12 = vadd.f32 %v1527_v11, %v1835_v18 }
 0x29a   : > { %v1042_v13 = vpop.f32.mrf.mxu0 }
 0x29b   : > { %1090 = vst.msk [vmem:[%s1842_s8 + $0xe8] sm:$0xff] %vm217_vm0, %v1048_v12  ;;  %v1043_v9 = vadd.f32 %v1042_v13, %v1835_v18 }
 0x29c   : > { %v1530_v14 = vpop.f32.mrf.mxu0 }
 0x29d   : > { %1089 = vst.msk [vmem:[%s1842_s8 + $0xe0] sm:$0xff] %vm217_vm0, %v1043_v9  ;;  %v1058_v15 = vadd.f32 %v1530_v14, %v1835_v18 }
 0x29e   : > { %v1052_v16 = vpop.f32.mrf.mxu0 }
 0x29f   : > { %1092 = vst.msk [vmem:[%s1842_s8 + $0xf8] sm:$0xff] %vm217_vm0, %v1058_v15  ;;  %v1053_v41 = vadd.f32 %v1052_v16, %v1835_v18 }
 0x2a1   : > { %1091 = vst.msk [vmem:[%s1842_s8 + $0xf0] sm:$0xff] %vm217_vm0, %v1053_v41 }
 0x2a2 PF: > { %s12_s9 = sadd.s32 1, %s1547_s9  }
 0x2a3   : > { %p9_p4 = scmp.ge.s32.totalorder %s12_s9, 4  }
 0x2a5   :  { %11 = sbr.rel (!%p9_p4) target bundleno = 1 (0x1), region = 58 }

</bundles_post_ra>
